<compile_context>
chip_gen: v6e
topology: v6e:2x2x1
jax: 0.10.0
libtpu: 0.0.40
codegen_flags: <defaults>
</compile_context>

<pallas_src>
import functools

import jax
import jax.numpy as jnp
from jax import lax
from jax.experimental import pallas as pl
from jax.experimental.pallas import tpu as pltpu

# ogb get_bond_feature_dims()
BOND_FEATURE_DIMS = [5, 6, 2]
_OFFSETS = tuple(int(sum(BOND_FEATURE_DIMS[:i])) for i in range(len(BOND_FEATURE_DIMS)))
_TOT = sum(BOND_FEATURE_DIMS)                      # 13
_TOT_PAD = -(-_TOT // 8) * 8                       # 16 (sublane-aligned stacked table)


# ----------------------------------------------------------------------------
# Kernel: one edge tile -> multi-hot [tE, TOT_PAD] -> single MXU matmul [tE, D]
# ----------------------------------------------------------------------------
def _bond_encoder_kernel(attr_ref, tbl_ref, out_ref, *, tot_pad, offsets):
    attr = attr_ref[...]                                           # [tE, C] int32
    te = attr.shape[0]
    col_iota = lax.broadcasted_iota(jnp.int32, (te, tot_pad), 1)   # [tE, TOT_PAD]

    # Multi-hot selection matrix: exactly one 1.0 per feature column per row,
    # columns land in disjoint offset ranges -> matmul == sum of 3 embeddings.
    mh = jnp.zeros((te, tot_pad), jnp.float32)
    for i, off in enumerate(offsets):                              # static (3 cols)
        idx = attr[:, i:i + 1] + off                               # [tE, 1]
        mh = mh + (col_iota == idx).astype(jnp.float32)

    out_ref[...] = jnp.dot(mh, tbl_ref[...],
                           preferred_element_type=jnp.float32,
                           precision=lax.Precision.HIGHEST)


# ----------------------------------------------------------------------------
# Wrapper: stack/pad tables once, tile the edge axis, single fused pallas_call
# ----------------------------------------------------------------------------
def stack_bond_tables(tables):
    """[d_i, D] fp32 tables -> one [TOT_PAD, D] fp32 table (zero-padded rows)."""
    tbl = jnp.concatenate(tables, axis=0)                          # [13, D]
    return jnp.pad(tbl, ((0, _TOT_PAD - _TOT), (0, 0)))            # [16, D]


def bond_encoder(edge_attr, tbl_stacked, *, block_e=128):
    """edge_attr: [E, 3] int32, tbl_stacked: [TOT_PAD, D] fp32 -> [E, D] fp32."""
    E, C = edge_attr.shape
    D = tbl_stacked.shape[1]

    # pad E up to a multiple of the tile (index 0 is always a valid row).
    E_pad = -(-E // block_e) * block_e
    if E_pad != E:
        edge_attr = jnp.pad(edge_attr, ((0, E_pad - E), (0, 0)))

    kernel = functools.partial(_bond_encoder_kernel,
                               tot_pad=_TOT_PAD, offsets=_OFFSETS)
    out = pl.pallas_call(
        kernel,
        out_shape=jax.ShapeDtypeStruct((E_pad, D), jnp.float32),
        grid=(E_pad // block_e,),
        in_specs=[
            pl.BlockSpec((block_e, C), lambda i: (i, 0)),          # edge_attr tile
            pl.BlockSpec((_TOT_PAD, D), lambda i: (0, 0)),         # stacked table (resident)
        ],
        out_specs=pl.BlockSpec((block_e, D), lambda i: (i, 0)),    # lane-dense output
        compiler_params=pltpu.CompilerParams(
            dimension_semantics=("parallel",)),                    # v7x: shard tiles over TCs
    )(edge_attr, tbl_stacked)
    return out[:E]


# ----------------------------------------------------------------------------
# Deterministic synthetic parameters (xavier_uniform, as in the module)
# ----------------------------------------------------------------------------
def init_bond_tables(key, emb_dim):
    tables = []
    for i, d in enumerate(BOND_FEATURE_DIMS):
        bound = (6.0 / (d + emb_dim)) ** 0.5
        tables.append(jax.random.uniform(jax.random.fold_in(key, i),
                                         (d, emb_dim), jnp.float32, -bound, bound))
    return tables


if __name__ == "__main__":
    E, D = 256, 128                       # edges, emb_dim (lane-dense)
    key = jax.random.PRNGKey(0)
    k_attr, k_tbl = jax.random.split(key)

    edge_attr = jnp.stack(
        [jax.random.randint(jax.random.fold_in(k_attr, i), (E,), 0, d)
         for i, d in enumerate(BOND_FEATURE_DIMS)], axis=1).astype(jnp.int32)   # [E, 3]

    tables = init_bond_tables(k_tbl, D)
    tbl_stacked = stack_bond_tables(tables)

    out = bond_encoder(edge_attr, tbl_stacked)
    jax.block_until_ready(out)

    # reference: plain JAX embedding-lookup sum (matches PyTorch forward)
    ref = sum(jnp.take(t, edge_attr[:, i], axis=0) for i, t in enumerate(tables))
    assert out.shape == (E, D)
    assert jnp.allclose(out, ref, atol=1e-5, rtol=1e-5)
    print("KERNEL_OK")
</pallas_src>

<mosaic_0001>
module attributes {stable_mosaic.version = 11 : i64} {
  func.func @_bond_encoder_kernel(%arg0: i32, %arg1: memref<128x3xi32, #tpu.memory_space<vmem>>, %arg2: memref<16x128xf32, #tpu.memory_space<vmem>>, %arg3: memref<128x128xf32, #tpu.memory_space<vmem>>) attributes {dimension_semantics = [#tpu.dimension_semantics<parallel>], iteration_bounds = array<i64: 2>, scalar_prefetch = 0 : i64, scratch_operands = 0 : i64, tpu.core_type = #tpu.core_type<tc>, window_params = [{transform_indices = @transform_0, window_bounds = array<i64: 128, 3>}, {pipeline_mode = #tpu.pipeline_mode<synchronous>, transform_indices = @transform_1, window_bounds = array<i64: 16, 128>}, {transform_indices = @transform_2, window_bounds = array<i64: 128, 128>}]} {
    %c0 = arith.constant 0 : index
    %c0_0 = arith.constant 0 : index
    %0 = vector.load %arg1[%c0, %c0_0] : memref<128x3xi32, #tpu.memory_space<vmem>>, vector<128x3xi32>
    %1 = tpu.iota {dimensions = array<i32: 1>} : vector<128x16xi32>
    %cst = arith.constant 0.000000e+00 : f32
    %2 = vector.broadcast %cst : f32 to vector<128x16xf32>
    %3 = vector.extract_strided_slice %0 {offsets = [0, 0], sizes = [128, 1], strides = [1, 1]} : vector<128x3xi32> to vector<128x1xi32>
    %c0_i32 = arith.constant 0 : i32
    %4 = vector.broadcast %c0_i32 : i32 to vector<128x1xi32>
    %5 = arith.addi %3, %4 : vector<128x1xi32>
    %6 = vector.broadcast %5 : vector<128x1xi32> to vector<128x16xi32>
    %7 = arith.cmpi eq, %1, %6 : vector<128x16xi32>
    %8 = arith.extui %7 : vector<128x16xi1> to vector<128x16xi32>
    %9 = arith.sitofp %8 : vector<128x16xi32> to vector<128x16xf32>
    %10 = arith.addf %2, %9 : vector<128x16xf32>
    %11 = vector.extract_strided_slice %0 {offsets = [0, 1], sizes = [128, 1], strides = [1, 1]} : vector<128x3xi32> to vector<128x1xi32>
    %c5_i32 = arith.constant 5 : i32
    %12 = vector.broadcast %c5_i32 : i32 to vector<128x1xi32>
    %13 = arith.addi %11, %12 : vector<128x1xi32>
    %14 = vector.broadcast %13 : vector<128x1xi32> to vector<128x16xi32>
    %15 = arith.cmpi eq, %1, %14 : vector<128x16xi32>
    %16 = arith.extui %15 : vector<128x16xi1> to vector<128x16xi32>
    %17 = arith.sitofp %16 : vector<128x16xi32> to vector<128x16xf32>
    %18 = arith.addf %10, %17 : vector<128x16xf32>
    %19 = vector.extract_strided_slice %0 {offsets = [0, 2], sizes = [128, 1], strides = [1, 1]} : vector<128x3xi32> to vector<128x1xi32>
    %c11_i32 = arith.constant 11 : i32
    %20 = vector.broadcast %c11_i32 : i32 to vector<128x1xi32>
    %21 = arith.addi %19, %20 : vector<128x1xi32>
    %22 = vector.broadcast %21 : vector<128x1xi32> to vector<128x16xi32>
    %23 = arith.cmpi eq, %1, %22 : vector<128x16xi32>
    %24 = arith.extui %23 : vector<128x16xi1> to vector<128x16xi32>
    %25 = arith.sitofp %24 : vector<128x16xi32> to vector<128x16xf32>
    %26 = arith.addf %18, %25 : vector<128x16xf32>
    %c0_1 = arith.constant 0 : index
    %c0_2 = arith.constant 0 : index
    %27 = vector.load %arg2[%c0_1, %c0_2] : memref<16x128xf32, #tpu.memory_space<vmem>>, vector<16x128xf32>
    %cst_3 = arith.constant dense<0.000000e+00> : vector<128x128xf32>
    %28 = tpu.matmul %26, %27, %cst_3 {dimension_numbers = #tpu.dot_dimension_numbers<[1], [0], [0], [1], [0, 0, 1, 1], [], []>, precision = #tpu.contract_precision<fp32>} : vector<128x16xf32>, vector<16x128xf32>, vector<128x128xf32> -> vector<128x128xf32>
    %c0_4 = arith.constant 0 : index
    %c0_5 = arith.constant 0 : index
    %29 = vector.load %arg3[%c0_4, %c0_5] : memref<128x128xf32, #tpu.memory_space<vmem>>, vector<128x128xf32>
    tpu.vector_store %arg3[%c0_4, %c0_5], %28 {strides = array<i32>} : memref<128x128xf32, #tpu.memory_space<vmem>>, vector<128x128xf32>,
    return
  }
  func.func @transform_0(%arg0: i32) -> (i32, i32) {
    %c0_i32 = arith.constant 0 : i32
    %c0_i32_0 = arith.constant 0 : i32
    return %arg0, %c0_i32 : i32, i32
  }
  func.func @transform_1(%arg0: i32) -> (i32, i32) {
    %c0_i32 = arith.constant 0 : i32
    %c0_i32_0 = arith.constant 0 : i32
    %c0_i32_1 = arith.constant 0 : i32
    return %c0_i32, %c0_i32_0 : i32, i32
  }
  func.func @transform_2(%arg0: i32) -> (i32, i32) {
    %c0_i32 = arith.constant 0 : i32
    %c0_i32_0 = arith.constant 0 : i32
    return %arg0, %c0_i32 : i32, i32
  }
}

</mosaic_0001>

<bundles_post_ra>
// kernel: tpu_custom_call.1
= control target key start
LH: loop header
LB: loop body
LE: loop exit
PB: predicated region body
PF: predicated region fallthrough
CT: control target
= control target key end

     0   :  { %7 = vsyncpa [#allocation3], 0  ;;  %s3017_s0 = inlined_call_operand.vmem [shape: s32[256,3], index: 0, kind: input, shape index: {}]   ;;  %s3018_s1 = inlined_call_operand.vmem [shape: f32[16,128], index: 1, kind: input, shape index: {}]   ;;  %s3019_s2 = inlined_call_operand.hbm [shape: f32[256,128], index: 2, kind: output, shape index: {}]  }
   0x1   :  { %9 = vsyncpa [#allocation3 + $0x1], 0  ;;  %s2272_s9 = smov 0   ;;  %s2274_s10 = smov 0  }
   0x2   :  { %s2276_s11 = smov 0   ;;  %s2278_s12 = smov 0  }
   0x3 LB: > { %s2293_s13 = sadd.s32 4294967295, %s2248_s12   ;;  %s1778_s14 = sadd.s32 4294967294, %s2248_s12   ;;  %s2248_s12 = sphi %s2278_s12, %s3051_s12   ;;  %s2244_s11 = sphi %s2276_s11, %s3050_s11   ;;  %s2240_s10 = sphi %s2274_s10, %s3049_s10   ;;  %s2236_s9 = sphi %s2272_s9, %s3048_s9  }
   0x4   : > { %s2297_s15 = sadd.s32 1, %s2248_s12   ;;  %s69_s16 = sadd.s32 1, %s2244_s11 }
   0x5   : > { %s66_s17 = ssub.s32 %s2248_s12, %s2297_s15  ;;  %p79_p0 = scmp.ne.s32.totalorder %s2244_s11, %s2240_s10 }
   0x6   : > { %p67_p1 = scmp.eq.s32.totalorder %s66_s17, 0  ;;  %p80_p2 = scmp.eq.s32.totalorder %s2293_s13, 1 }
   0x7   : > { %p85_p3 = scmp.ne.s32.totalorder %s2240_s10, %s2236_s9  ;;  %p86_p4 = scmp.eq.s32.totalorder %s1778_s14, 1 }
   0x8   : > { %s2308_s18 = scalar_select %p67_p1, %s2244_s11, %s69_s16  }
   0x9   : > { %p2310_p5 = por %p80_p2, %p79_p0  ;;  %p2314_p6 = por %p86_p4, %p85_p3 }
   0xa   : > { %p1781_p7 = scmp.ge.s32.totalorder %s2248_s12, 1  ;;  %p116_p8 = scmp.lt.s32.totalorder %s2248_s12, 3 }
   0xc   : > { %p117_p9 = pnand %p1781_p7, %p116_p8 }
   0xe   : > { %120 = sbr.rel (%p117_p9) target bundleno = 586 (0x24a), region = 28 }
  0x13   : > { %s1783_s21 = sshll.u32 %s2293_s13, 4  ;;  %v2250_v0 = vmov 0   ;;  %v2251_v5 = vmov 1   ;;  %v2252_v8 = vmov 2   ;;  %v532_v18 = vld [vmem:[%s3018_s1 + $0x8] sm:$0xff]  ;;  %v531_v20 = vld [vmem:[%s3018_s1] sm:$0xff]  ;;  %v161_v58 = vlaneseq }
  0x14   : > { %2161 = vset.pattern.permute.xlu1 %v2250_v0  ;;  %2160 = vset.pattern.permute.xlu0 %v2250_v0  ;;  %p139_p10 = scmp.lt.s32.totalorder %s1783_s21, 31  ;;  %v2358_v19 = vand.u32 4294901760, %v532_v18  ;;  %v2367_v22 = vand.u32 4294901760, %v531_v20  ;;  %vm533_vm3 = vcmask 130048   ;;  %s135_s30 = sand.u32 1, %s2240_s10  }
  0x15   : > { %v2424_v62 = vand.u32 127, %v161_v58  ;;  %s1782_s3 = sshll.u32 %s135_s30, 7  ;;  %s1838_s5 = sshll.u32 %s2293_s13, 11 }
  0x16   : > { %s3053_s21 = smov (!%p139_p10, %s1783_s21), 31  ;;  %v2365_v21 = vsub.f32 %v532_v18, %v2358_v19  ;;  %1947 = vmatprep.subr.mxu0 %v2358_v19  ;;  %v2379_v26 = vsub.f32 %v531_v20, %v2367_v22  ;;  %s2909_s4 = scalar_lea.vmem [#allocation2], %s1782_s3 }
  0x17   : > { %s1784_s22 = sshll.u32 %s3053_s21, 3  ;;  %1948 = vmatpush3.msra.mxu0 %v2358_v19  ;;  %s1716_s6 = sshll.u32 %s2909_s4, 4  ;;  %s2971_s6 = int_to_ptr.vmem [resolvable:$true] %s1716_s6 }
  0x18   : > { %s2326_s25 = scalar_lea.vmem %s3017_s0, %s1784_s22  ;;  %v2376_v25 = vand.u32 4294901760, %v2365_v21  ;;  %1949 = vmatprep.subr.mxu0 %v2367_v22  ;;  %v2388_v28 = vand.u32 4294901760, %v2379_v26  ;;  %s2969_s14 = scalar_lea.hbm %s3019_s2, %s1838_s5 }
  0x19   : > { %v146_v1 = vld [vmem:[%s2326_s25 + $0x8] sm:$0xff]  ;;  %v145_v2 = vld [vmem:[%s2326_s25] sm:$0xff]  ;;  %v148_v7 = vld [vmem:[%s2326_s25 + $0x18] sm:$0xff]  ;;  %1950 = vmatpush3.msra.mxu0 %v2367_v22  ;;  %s2977_s13 = scalar_lea.sflag [#allocation3], %s135_s30  ;;  %s2188_s16 = scalar_lea.vmem %s2971_s6, 2048 }
  0x1a   : > { %167 = vperm.xlu1 %2161, %v146_v1   ;;  %164 = vperm.xlu0 %2160, %v145_v2   ;;  %v276_v3 = vadd.s32 5, %v146_v1  ;;  %v275_v4 = vadd.s32 5, %v145_v2  ;;  %v403_v6 = vadd.s32 11, %v145_v2  ;;  %v150_v9 = vld [vmem:[%s2326_s25 + $0x28] sm:$0xff]  ;;  %v147_v10 = vld [vmem:[%s2326_s25 + $0x10] sm:$0xff]  ;;  %v2339_v11 = vld [vmem:[%s2326_s25 + $0x38] sm:$0xff]  ;;  %v841_v27 = vsub.f32 %v2365_v21, %v2376_v25  ;;  %p2189_p11 = scmp.ne.s32.totalorder %s2971_s6, %s2188_s16 }
  0x1b   : > { %v277_v12 = vadd.s32 5, %v147_v10  ;;  %v2344_v13 = vld [vmem:[%s2326_s25 + $0x48] sm:$0xff]  ;;  %v278_v14 = vadd.s32 5, %v148_v7  ;;  %v2348_v15 = vld [vmem:[%s2326_s25 + $0x58] sm:$0xff]  ;;  %v405_v16 = vadd.s32 11, %v147_v10  ;;  %v149_v23 = vld [vmem:[%s2326_s25 + $0x20] sm:$0xff]  ;;  %2003 = vmatprep.subr.mxu0 %v2365_v21  ;;  %v848_v32 = vsub.f32 %v2379_v26, %v2388_v28 }
  0x1c   : > { %v2352_v17 = vld [vmem:[%s2326_s25 + $0x68] sm:$0xff]  ;;  %v2372_v24 = vld [vmem:[%s2326_s25 + $0x78] sm:$0xff]  ;;  %v279_v29 = vadd.s32 5, %v149_v23  ;;  %v404_v30 = vadd.s32 11, %v146_v1  ;;  %v842_v31 = vand.u32 4294901760, %v841_v27  ;;  %v280_v34 = vadd.s32 5, %v150_v9  ;;  %p2190_p12 = pnand %p2189_p11, %p2310_p5 }
  0x1d   : > { %v849_v33 = vand.u32 4294901760, %v848_v32  ;;  %v406_v35 = vadd.s32 11, %v148_v7  ;;  %v408_v36 = vadd.s32 11, %v150_v9  ;;  %v407_v37 = vadd.s32 11, %v149_v23  ;;  %v151_v39 = vld [vmem:[%s2326_s25 + $0x30] sm:$0xff]  ;;  %v153_v47 = vld [vmem:[%s2326_s25 + $0x40] sm:$0xff] }
  0x1e   : > { %2163 = vset.pattern.permute.xlu1 %v2251_v5  ;;  %2162 = vset.pattern.permute.xlu0 %v2251_v5  ;;  %v410_v38 = vadd.s32 11, %v2339_v11  ;;  %v412_v40 = vadd.s32 11, %v2344_v13  ;;  %v281_v41 = vadd.s32 5, %v151_v39  ;;  %v414_v42 = vadd.s32 11, %v2348_v15  ;;  %v155_v51 = vld [vmem:[%s2326_s25 + $0x50] sm:$0xff]  ;;  %v157_v55 = vld [vmem:[%s2326_s25 + $0x60] sm:$0xff]  ;;  %p2191_p13 = pneg %p2190_p12 }
  0x1f   : > { %295 = vperm.xlu1 %2163, %v276_v3   ;;  %292 = vperm.xlu0 %2162, %v275_v4   ;;  %v282_v43 = vadd.s32 5, %v2339_v11  ;;  %v416_v44 = vadd.s32 11, %v2352_v17  ;;  %v409_v45 = vadd.s32 11, %v151_v39  ;;  %v418_v46 = vadd.s32 11, %v2372_v24  ;;  %v159_v63 = vld [vmem:[%s2326_s25 + $0x70] sm:$0xff]  ;;  %s2254_s17 = smov [#allocation2]  }
  0x20   : > { %1975 = vmatprep.subr.mxu1 %v842_v31  ;;  %v283_v48 = vadd.s32 5, %v153_v47  ;;  %v284_v49 = vadd.s32 5, %v2344_v13  ;;  %v411_v50 = vadd.s32 11, %v153_v47  ;;  %v285_v52 = vadd.s32 5, %v155_v51  ;;  %s2192_s21 = sshll.u32 %s2254_s17, 4  ;;  %s2193_s21 = int_to_ptr.vmem [resolvable:$false] %s2192_s21 }
  0x21   : > { %1976 = vmatpush3.msra.mxu1 %v842_v31  ;;  %v286_v53 = vadd.s32 5, %v2348_v15  ;;  %v413_v54 = vadd.s32 11, %v155_v51  ;;  %v287_v56 = vadd.s32 5, %v157_v55  ;;  %v288_v57 = vadd.s32 5, %v2352_v17  ;;  %s2194_s22 = scalar_lea.vmem %s2193_s21, 4096  ;;  %p2195_p0 = scmp.lt.s32.totalorder %s2971_s6, %s2193_s21 }
  0x22   : > { %1977 = vmatprep.subr.mxu1 %v849_v33  ;;  %v415_v59 = vadd.s32 11, %v157_v55  ;;  %v2253_v3 = vmov 0.0   ;;  %v417_v18 = vadd.s32 11, %v159_v63  ;;  %p2196_p1 = scmp.lt.s32.totalorder %s2194_s22, %s2188_s16 }
  0x23   : > { %2164 = vset.pattern.permute.xlu1 %v2252_v8  ;;  %2167 = vset.pattern.permute.xlu0 %v2250_v0 }
  0x24   : > { %420 = vperm.xlu1 %2164, %v403_v6   ;;  %173 = vperm.xlu0 %2167, %v148_v7   ;;  %v289_v7 = vadd.s32 5, %v159_v63  ;;  %p2197_p2 = por %p2196_p1, %p2195_p0 }
  0x25   : > { %1978 = vmatpush3.msra.mxu1 %v849_v33 }
  0x26   : > { %2031 = vmatprep.subr.mxu1 %v2358_v19  ;;  %p2198_p3 = pnand %p2197_p2, %p2191_p13 }
  0x28   : > { %2165 = vset.pattern.permute.xlu1 %v2250_v0  ;;  %179 = vperm.xlu0 %2167, %v150_v9  }
  0x29   : > { %170 = vperm.xlu1 %2165, %v147_v10  }
  0x2c   : > { %185 = vperm.xlu0 %2167, %v2339_v11  }
  0x2d   : > { %2166 = vset.pattern.permute.xlu1 %v2251_v5 }
  0x2e   : > { %298 = vperm.xlu1 %2166, %v277_v12  }
  0x30   : > { %191 = vperm.xlu0 %2167, %v2344_v13  }
  0x32   : > { %301 = vperm.xlu1 %2166, %v278_v14  }
  0x34   : > { %197 = vperm.xlu0 %2167, %v2348_v15  }
  0x36   : > { %2168 = vset.pattern.permute.xlu1 %v2252_v8 }
  0x37   : > { %426 = vperm.xlu1 %2168, %v405_v16  }
  0x38   : > { %203 = vperm.xlu0 %2167, %v2352_v17  }
  0x3b   : > { %2169 = vset.pattern.permute.xlu1 %v2250_v0 }
  0x3c   : > { %176 = vperm.xlu1 %2169, %v149_v23   ;;  %209 = vperm.xlu0 %2167, %v2372_v24  }
  0x40   : > { %2170 = vset.pattern.permute.xlu1 %v2251_v5  ;;  %2186 = vset.pattern.permute.xlu0 %v2252_v8 }
  0x41   : > { %304 = vperm.xlu1 %2170, %v279_v29   ;;  %423 = vperm.xlu0 %2186, %v404_v30  }
  0x45   : > { %307 = vperm.xlu1 %2170, %v280_v34   ;;  %429 = vperm.xlu0 %2186, %v406_v35  }
  0x49   : > { %2171 = vset.pattern.permute.xlu1 %v2252_v8  ;;  %435 = vperm.xlu0 %2186, %v408_v36  }
  0x4a   : > { %432 = vperm.xlu1 %2171, %v407_v37  }
  0x4d   : > { %441 = vperm.xlu0 %2186, %v410_v38  }
  0x4e   : > { %2172 = vset.pattern.permute.xlu1 %v2250_v0 }
  0x4f   : > { %182 = vperm.xlu1 %2172, %v151_v39  }
  0x51   : > { %447 = vperm.xlu0 %2186, %v412_v40  }
  0x53   : > { %2173 = vset.pattern.permute.xlu1 %v2251_v5 }
  0x54   : > { %310 = vperm.xlu1 %2173, %v281_v41  }
  0x55   : > { %453 = vperm.xlu0 %2186, %v414_v42  }
  0x58   : > { %313 = vperm.xlu1 %2173, %v282_v43  }
  0x59   : > { %459 = vperm.xlu0 %2186, %v416_v44  }
  0x5c   : > { %2174 = vset.pattern.permute.xlu1 %v2252_v8 }
  0x5d   : > { %438 = vperm.xlu1 %2174, %v409_v45   ;;  %465 = vperm.xlu0 %2186, %v418_v46  }
  0x61   : > { %2175 = vset.pattern.permute.xlu1 %v2250_v0 }
  0x62   : > { %188 = vperm.xlu1 %2175, %v153_v47  }
  0x66   : > { %2176 = vset.pattern.permute.xlu1 %v2251_v5 }
  0x67   : > { %316 = vperm.xlu1 %2176, %v283_v48  }
  0x6b   : > { %319 = vperm.xlu1 %2176, %v284_v49  }
  0x6f   : > { %2177 = vset.pattern.permute.xlu1 %v2252_v8 }
  0x70   : > { %444 = vperm.xlu1 %2177, %v411_v50  }
  0x74   : > { %2178 = vset.pattern.permute.xlu1 %v2250_v0 }
  0x75   : > { %194 = vperm.xlu1 %2178, %v155_v51  }
  0x79   : > { %2179 = vset.pattern.permute.xlu1 %v2251_v5 }
  0x7a   : > { %322 = vperm.xlu1 %2179, %v285_v52  }
  0x7e   : > { %325 = vperm.xlu1 %2179, %v286_v53  }
  0x82   : > { %2180 = vset.pattern.permute.xlu1 %v2252_v8 }
  0x83   : > { %450 = vperm.xlu1 %2180, %v413_v54  }
  0x87   : > { %2181 = vset.pattern.permute.xlu1 %v2250_v0 }
  0x88   : > { %200 = vperm.xlu1 %2181, %v157_v55  }
  0x8c   : > { %2182 = vset.pattern.permute.xlu1 %v2251_v5 }
  0x8d   : > { %328 = vperm.xlu1 %2182, %v287_v56  }
  0x91   : > { %331 = vperm.xlu1 %2182, %v288_v57  }
  0x95   : > { %v2421_v60 = vpop.permute.xlu1 %167  ;;  %2183 = vset.pattern.permute.xlu1 %v2252_v8  ;;  %v165_v61 = vpop.permute.xlu0 %164 }
  0x96   : > { %456 = vperm.xlu1 %2183, %v415_v59   ;;  %vm211_vm0 = vcmp.eq.s32.totalorder %v2424_v62, %v165_v61  ;;  %vm212_vm8 = vcmp.eq.s32.totalorder %v2424_v62, %v2421_v60 }
  0x97   : > { %v1785_v4 = vsel %vm211_vm0, 1.0, %v2253_v3  ;;  %v1786_v43 = vsel %vm212_vm8, 1.0, %v2253_v3 }
  0x9a   : > { %v296_v1 = vpop.permute.xlu1 %295  ;;  %2184 = vset.pattern.permute.xlu1 %v2250_v0  ;;  %v293_v2 = vpop.permute.xlu0 %292  ;;  %v290_v0 = vadd.s32 5, %v2372_v24 }
  0x9b   : > { %206 = vperm.xlu1 %2184, %v159_v63   ;;  %vm339_vm1 = vcmp.eq.s32.totalorder %v2424_v62, %v293_v2  ;;  %vm340_vm7 = vcmp.eq.s32.totalorder %v2424_v62, %v296_v1 }
  0x9c   : > { %v1801_v6 = vsel %vm339_vm1, 1.0, %v2253_v3  ;;  %v1802_v42 = vsel %vm340_vm7, 1.0, %v2253_v3 }
  0x9d   : > { %v387_v9 = vadd.f32 %v1801_v6, %v1785_v4  ;;  %v388_v45 = vadd.f32 %v1802_v42, %v1786_v43 }
  0x9f   : > { %2185 = vset.pattern.permute.xlu1 %v2251_v5  ;;  %v421_v10 = vpop.permute.xlu1 %420  ;;  %v174_v11 = vpop.permute.xlu0 %173 }
  0xa0   : > { %vm467_vm2 = vcmp.eq.s32.totalorder %v2424_v62, %v421_v10  ;;  %334 = vperm.xlu1 %2185, %v289_v7   ;;  %vm214_vm9 = vcmp.eq.s32.totalorder %v2424_v62, %v174_v11 }
  0xa1   : > { %v1817_v12 = vsel %vm467_vm2, 1.0, %v2253_v3  ;;  %v1788_v48 = vsel %vm214_vm9, 1.0, %v2253_v3 }
  0xa2   : > { %v515_v13 = vadd.f32 %v1817_v12, %v387_v9 }
  0xa3   : > { %v180_v14 = vpop.permute.xlu0 %179 }
  0xa4   : > { %v535_v15 = vsel %vm533_vm3, %v515_v13, 0  ;;  %337 = vperm.xlu1 %2185, %v290_v0   ;;  %v171_v16 = vpop.permute.xlu1 %170  ;;  %vm216_vm11 = vcmp.eq.s32.totalorder %v2424_v62, %v180_v14 }
  0xa5   : > { %v2437_v17 = vand.u32 4294901760, %v535_v15  ;;  %vm213_vm5 = vcmp.eq.s32.totalorder %v2424_v62, %v171_v16  ;;  %v1790_v53 = vsel %vm216_vm11, 1.0, %v2253_v3 }
  0xa6   : > { %v1787_v33 = vsel %vm213_vm5, 1.0, %v2253_v3 }
  0xa7   : > { %1979 = vmatprep.mubr.f32.mxu1 %v2437_v17  ;;  %v2440_v5 = vpop.permute.xlu0 %185  ;;  %v2443_v20 = vsub.f32 %v535_v15, %v2437_v17 }
  0xa8   : > { %2187 = vset.pattern.permute.xlu1 %v2252_v8 }
  0xa9   : > { %462 = vperm.xlu1 %2187, %v417_v18   ;;  %v299_v23 = vpop.permute.xlu1 %298  ;;  %v651_v24 = vand.u32 4294901760, %v2443_v20 }
  0xaa   : > { %vm341_vm4 = vcmp.eq.s32.totalorder %v2424_v62, %v299_v23 }
  0xab   : > { %v2447_v27 = vpop.permute.xlu0 %191  ;;  %v652_v29 = vsub.f32 %v2443_v20, %v651_v24  ;;  %v1803_v8 = vsel %vm341_vm4, 1.0, %v2253_v3  ;;  %vm218_vm4 = vcmp.eq.s32.totalorder %v2424_v62, %v2440_v5 }
  0xac   : > { %v389_v35 = vadd.f32 %v1803_v8, %v1787_v33 }
  0xad   : > { %v302_v30 = vpop.permute.xlu1 %301  ;;  %v653_v31 = vand.u32 4294901760, %v652_v29 }
  0xae   : > { %vm342_vm10 = vcmp.eq.s32.totalorder %v2424_v62, %v302_v30 }
  0xaf   : > { %1951 = vmatprep.mubr.f32.mxu0 %v653_v31  ;;  %v2454_v32 = vpop.permute.xlu0 %197  ;;  %v1804_v49 = vsel %vm342_vm10, 1.0, %v2253_v3  ;;  %vm220_vm10 = vcmp.eq.s32.totalorder %v2424_v62, %v2447_v27 }
  0xb0   : > { %v390_v54 = vadd.f32 %v1804_v49, %v1788_v48 }
  0xb2   : > { %v427_v34 = vpop.permute.xlu1 %426 }
  0xb3   : > { %vm469_vm6 = vcmp.eq.s32.totalorder %v2424_v62, %v427_v34  ;;  %v2459_v36 = vpop.permute.xlu0 %203 }
  0xb4   : > { %v1819_v37 = vsel %vm469_vm6, 1.0, %v2253_v3 }
  0xb5   : > { %v517_v38 = vadd.f32 %v1819_v37, %v389_v35 }
  0xb7   : > { %v177_v39 = vpop.permute.xlu1 %176  ;;  %v2463_v40 = vpop.permute.xlu0 %209  ;;  %v541_v41 = vsel %vm533_vm3, %v517_v38, 0 }
  0xb8   : > { %v2472_v44 = vand.u32 4294901760, %v541_v41  ;;  %vm215_vm14 = vcmp.eq.s32.totalorder %v2424_v62, %v177_v39 }
  0xb9   : > { %v1789_v2 = vsel %vm215_vm14, 1.0, %v2253_v3 }
  0xba   : > { %v2480_v51 = vsub.f32 %v541_v41, %v2472_v44 }
  0xbc   : > { %v305_v46 = vpop.permute.xlu1 %304  ;;  %v424_v47 = vpop.permute.xlu0 %423  ;;  %v671_v1 = vand.u32 4294901760, %v2480_v51 }
  0xbd   : > { %vm468_vm12 = vcmp.eq.s32.totalorder %v2424_v62, %v424_v47  ;;  %vm343_vm13 = vcmp.eq.s32.totalorder %v2424_v62, %v305_v46 }
  0xbe   : > { %v1818_v50 = vsel %vm468_vm12, 1.0, %v2253_v3  ;;  %v1805_v58 = vsel %vm343_vm13, 1.0, %v2253_v3  ;;  %v672_v16 = vsub.f32 %v2480_v51, %v671_v1 }
  0xbf   : > { %v516_v52 = vadd.f32 %v1818_v50, %v388_v45  ;;  %v391_v7 = vadd.f32 %v1805_v58, %v1789_v2 }
  0xc0   : > { %v308_v55 = vpop.permute.xlu1 %307  ;;  %v430_v56 = vpop.permute.xlu0 %429  ;;  %v673_v38 = vand.u32 4294901760, %v672_v16 }
  0xc1   : > { %v538_v57 = vsel %vm533_vm3, %v516_v52, 0  ;;  %vm344_vm15 = vcmp.eq.s32.totalorder %v2424_v62, %v308_v55  ;;  %vm470_vm0 = vcmp.eq.s32.totalorder %v2424_v62, %v430_v56 }
  0xc2   : > { %v2489_v59 = vand.u32 4294901760, %v538_v57  ;;  %v1806_v60 = vsel %vm344_vm15, 1.0, %v2253_v3  ;;  %v1820_v61 = vsel %vm470_vm0, 1.0, %v2253_v3  ;;  %vm222_vm0 = vcmp.eq.s32.totalorder %v2424_v62, %v2454_v32 }
  0xc3   : > { %v518_v63 = vadd.f32 %v1820_v61, %v390_v54  ;;  %v392_v9 = vadd.f32 %v1806_v60, %v1790_v53 }
  0xc4   : > { %v2496_v4 = vsub.f32 %v538_v57, %v2489_v59  ;;  %1980 = vmatmul.mubr.f32.vlgmr.msra.gmra.mxu1 %v2489_v59  ;;  %v436_v6 = vpop.permute.xlu0 %435 }
  0xc5   : > { %v544_v10 = vsel %vm533_vm3, %v518_v63, 0  ;;  %vm472_vm1 = vcmp.eq.s32.totalorder %v2424_v62, %v436_v6  ;;  %v433_v11 = vpop.permute.xlu1 %432  ;;  %1982 = vmatprep.mubr.f32.mxu1 %v2472_v44  ;;  %2032 = vmatpush3.msra.mxu1 %v2358_v19 }
  0xc6   : > { %v2503_v0 = vand.u32 4294901760, %v544_v10  ;;  %v1822_v12 = vsel %vm472_vm1, 1.0, %v2253_v3  ;;  %vm471_vm2 = vcmp.eq.s32.totalorder %v2424_v62, %v433_v11  ;;  %v661_v13 = vand.u32 4294901760, %v2496_v4  ;;  %2033 = vmatprep.subr.mxu1 %v2367_v22 }
  0xc7   : > { %v520_v14 = vadd.f32 %v1822_v12, %v392_v9  ;;  %v1821_v15 = vsel %vm471_vm2, 1.0, %v2253_v3  ;;  %2034 = vmatpush3.msra.mxu1 %v2367_v22 }
  0xc8   : > { %v2515_v18 = vsub.f32 %v544_v10, %v2503_v0  ;;  %v519_v23 = vadd.f32 %v1821_v15, %v391_v7  ;;  %1983 = vmatmul.mubr.f32.gmra.mxu1 %v2503_v0  ;;  %v662_v29 = vsub.f32 %v2496_v4, %v661_v13  ;;  %2087 = vmatprep.subr.mxu1 %v2358_v19  ;;  %v442_v48 = vpop.permute.xlu0 %441 }
  0xc9   : > { %v550_v30 = vsel %vm533_vm3, %v520_v14, 0  ;;  %vm474_vm5 = vcmp.eq.s32.totalorder %v2424_v62, %v442_v48 }
  0xca   : > { %v2523_v31 = vand.u32 4294901760, %v550_v30  ;;  %v547_v8 = vsel %vm533_vm3, %v519_v23, 0  ;;  %v183_v33 = vpop.permute.xlu1 %182  ;;  %v663_v34 = vand.u32 4294901760, %v662_v29  ;;  %v681_v35 = vand.u32 4294901760, %v2515_v18 }
  0xcb   : > { %v2527_v37 = vand.u32 4294901760, %v547_v8  ;;  %vm217_vm8 = vcmp.eq.s32.totalorder %v2424_v62, %v183_v33  ;;  %v1794_v33 = vsel %vm220_vm10, 1.0, %v2253_v3 }
  0xcc   : > { %v2530_v39 = vsub.f32 %v550_v30, %v2523_v31  ;;  %1952 = vmatmul.mubr.f32.vlgmr.msra.gmra.mxu0 %v663_v34  ;;  %v682_v41 = vsub.f32 %v2515_v18, %v681_v35  ;;  %v1791_v57 = vsel %vm217_vm8, 1.0, %v2253_v3  ;;  %v448_v29 = vpop.permute.xlu0 %447 }
  0xcd   : > { %v2536_v42 = vsub.f32 %v547_v8, %v2527_v37  ;;  %1954 = vmatprep.mubr.f32.mxu0 %v673_v38  ;;  %1985 = vmatprep.mubr.f32.mxu1 %v2527_v37  ;;  %vm476_vm11 = vcmp.eq.s32.totalorder %v2424_v62, %v448_v29 }
  0xce   : > { %1986 = vmatmul.mubr.f32.gmra.mxu1 %v2523_v31  ;;  %v683_v43 = vand.u32 4294901760, %v682_v41  ;;  %v701_v45 = vand.u32 4294901760, %v2530_v39  ;;  %2004 = vmatpush3.msra.mxu0 %v2365_v21  ;;  %v1792_v21 = vsel %vm218_vm4, 1.0, %v2253_v3 }
  0xcf   : > { %v311_v46 = vpop.permute.xlu1 %310  ;;  %v691_v47 = vand.u32 4294901760, %v2536_v42  ;;  %2005 = vmatprep.subr.mxu0 %v2379_v26 }
  0xd0   : > { %1955 = vmatmul.mubr.f32.gmra.mxu0 %v683_v43  ;;  %v702_v49 = vsub.f32 %v2530_v39, %v701_v45  ;;  %vm345_vm6 = vcmp.eq.s32.totalorder %v2424_v62, %v311_v46  ;;  %v1826_v43 = vsel %vm476_vm11, 1.0, %v2253_v3 }
  0xd1   : > { %v692_v50 = vsub.f32 %v2536_v42, %v691_v47  ;;  %2006 = vmatpush3.msra.mxu0 %v2379_v26  ;;  %v1824_v26 = vsel %vm474_vm5, 1.0, %v2253_v3  ;;  %v1807_v55 = vsel %vm345_vm6, 1.0, %v2253_v3 }
  0xd2   : > { %2059 = vmatprep.subr.mxu0 %v2376_v25  ;;  %v703_v53 = vand.u32 4294901760, %v702_v49  ;;  %v393_v61 = vadd.f32 %v1807_v55, %v1791_v57 }
  0xd3   : > { %v314_v5 = vpop.permute.xlu1 %313  ;;  %v693_v52 = vand.u32 4294901760, %v692_v50 }
  0xd4   : > { %vm346_vm7 = vcmp.eq.s32.totalorder %v2424_v62, %v314_v5 }
  0xd5   : > { %v1808_v54 = vsel %vm346_vm7, 1.0, %v2253_v3  ;;  %1957 = vmatprep.mubr.f32.mxu0 %v693_v52  ;;  %vm224_vm7 = vcmp.eq.s32.totalorder %v2424_v62, %v2459_v36 }
  0xd6   : > { %v394_v56 = vadd.f32 %v1808_v54, %v1792_v21  ;;  %1958 = vmatmul.mubr.f32.gmra.mxu0 %v703_v53 }
  0xd8   : > { %v522_v58 = vadd.f32 %v1824_v26, %v394_v56  ;;  %v439_v60 = vpop.permute.xlu1 %438 }
  0xd9   : > { %vm473_vm9 = vcmp.eq.s32.totalorder %v2424_v62, %v439_v60 }
  0xda   : > { %v556_v63 = vsel %vm533_vm3, %v522_v58, 0  ;;  %v1823_v2 = vsel %vm473_vm9, 1.0, %v2253_v3 }
  0xdb   : > { %v2566_v6 = vand.u32 4294901760, %v556_v63  ;;  %v521_v7 = vadd.f32 %v1823_v2, %v393_v61 }
  0xdd   : > { %v2569_v9 = vsub.f32 %v556_v63, %v2566_v6  ;;  %v553_v10 = vsel %vm533_vm3, %v521_v7, 0  ;;  %v189_v11 = vpop.permute.xlu1 %188  ;;  %v454_v7 = vpop.permute.xlu0 %453 }
  0xde   : > { %v2572_v12 = vand.u32 4294901760, %v553_v10  ;;  %vm219_vm14 = vcmp.eq.s32.totalorder %v2424_v62, %v189_v11  ;;  %vm478_vm1 = vcmp.eq.s32.totalorder %v2424_v62, %v454_v7 }
  0xdf   : > { %v721_v14 = vand.u32 4294901760, %v2569_v9  ;;  %v1793_v49 = vsel %vm219_vm14, 1.0, %v2253_v3 }
  0xe0   : > { %v2576_v15 = vsub.f32 %v553_v10, %v2572_v12  ;;  %1988 = vmatprep.mubr.f32.mxu1 %v2572_v12 }
  0xe1   : > { %1989 = vmatmul.mubr.f32.gmra.mxu1 %v2566_v6  ;;  %v722_v30 = vsub.f32 %v2569_v9, %v721_v14 }
  0xe2   : > { %v317_v16 = vpop.permute.xlu1 %316  ;;  %v711_v23 = vand.u32 4294901760, %v2576_v15 }
  0xe3   : > { %vm347_vm12 = vcmp.eq.s32.totalorder %v2424_v62, %v317_v16  ;;  %v723_v41 = vand.u32 4294901760, %v722_v30 }
  0xe4   : > { %v712_v8 = vsub.f32 %v2576_v15, %v711_v23  ;;  %v1809_v46 = vsel %vm347_vm12, 1.0, %v2253_v3 }
  0xe5   : > { %v395_v5 = vadd.f32 %v1809_v46, %v1793_v49 }
  0xe6   : > { %v320_v34 = vpop.permute.xlu1 %319  ;;  %v713_v38 = vand.u32 4294901760, %v712_v8  ;;  %v1796_v8 = vsel %vm222_vm0, 1.0, %v2253_v3 }
  0xe7   : > { %vm348_vm13 = vcmp.eq.s32.totalorder %v2424_v62, %v320_v34  ;;  %v1828_v34 = vsel %vm478_vm1, 1.0, %v2253_v3 }
  0xe8   : > { %v1810_v27 = vsel %vm348_vm13, 1.0, %v2253_v3  ;;  %1960 = vmatprep.mubr.f32.mxu0 %v713_v38  ;;  %vm226_vm13 = vcmp.eq.s32.totalorder %v2424_v62, %v2463_v40 }
  0xe9   : > { %v396_v48 = vadd.f32 %v1810_v27, %v1794_v33  ;;  %1961 = vmatmul.mubr.f32.gmra.mxu0 %v723_v41 }
  0xeb   : > { %v524_v50 = vadd.f32 %v1826_v43, %v396_v48  ;;  %v445_v21 = vpop.permute.xlu1 %444 }
  0xec   : > { %vm475_vm15 = vcmp.eq.s32.totalorder %v2424_v62, %v445_v21 }
  0xed   : > { %v562_v52 = vsel %vm533_vm3, %v524_v50, 0  ;;  %v1825_v53 = vsel %vm475_vm15, 1.0, %v2253_v3 }
  0xee   : > { %v2601_v54 = vand.u32 4294901760, %v562_v52  ;;  %v523_v26 = vadd.f32 %v1825_v53, %v395_v5 }
  0xf0   : > { %v2604_v55 = vsub.f32 %v562_v52, %v2601_v54  ;;  %v559_v56 = vsel %vm533_vm3, %v523_v26, 0  ;;  %v195_v57 = vpop.permute.xlu1 %194 }
  0xf1   : > { %v2607_v58 = vand.u32 4294901760, %v559_v56  ;;  %vm221_vm5 = vcmp.eq.s32.totalorder %v2424_v62, %v195_v57 }
  0xf2   : > { %v741_v60 = vand.u32 4294901760, %v2604_v55  ;;  %v1795_v41 = vsel %vm221_vm5, 1.0, %v2253_v3 }
  0xf3   : > { %v2611_v61 = vsub.f32 %v559_v56, %v2607_v58  ;;  %1991 = vmatprep.mubr.f32.mxu1 %v2607_v58 }
  0xf4   : > { %1992 = vmatmul.mubr.f32.gmra.mxu1 %v2601_v54  ;;  %v742_v10 = vsub.f32 %v2604_v55, %v741_v60 }
  0xf5   : > { %v323_v63 = vpop.permute.xlu1 %322  ;;  %v731_v2 = vand.u32 4294901760, %v2611_v61 }
  0xf6   : > { %vm349_vm2 = vcmp.eq.s32.totalorder %v2424_v62, %v323_v63  ;;  %v743_v30 = vand.u32 4294901760, %v742_v10 }
  0xf7   : > { %v732_v11 = vsub.f32 %v2611_v61, %v731_v2  ;;  %v1811_v32 = vsel %vm349_vm2, 1.0, %v2253_v3 }
  0xf8   : > { %v397_v46 = vadd.f32 %v1811_v32, %v1795_v41 }
  0xf9   : > { %v326_v16 = vpop.permute.xlu1 %325  ;;  %v733_v29 = vand.u32 4294901760, %v732_v11 }
  0xfa   : > { %vm350_vm4 = vcmp.eq.s32.totalorder %v2424_v62, %v326_v16  ;;  %v460_v16 = vpop.permute.xlu0 %459 }
  0xfb   : > { %v1812_v33 = vsel %vm350_vm4, 1.0, %v2253_v3  ;;  %1963 = vmatprep.mubr.f32.mxu0 %v733_v29  ;;  %vm480_vm9 = vcmp.eq.s32.totalorder %v2424_v62, %v460_v16 }
  0xfc   : > { %v398_v38 = vadd.f32 %v1812_v33, %v1796_v8  ;;  %1964 = vmatmul.mubr.f32.gmra.mxu0 %v743_v30  ;;  %v1798_v33 = vsel %vm224_vm7, 1.0, %v2253_v3 }
  0xfe   : > { %v526_v27 = vadd.f32 %v1828_v34, %v398_v38  ;;  %v451_v43 = vpop.permute.xlu1 %450  ;;  %v1830_v38 = vsel %vm480_vm9, 1.0, %v2253_v3 }
  0xff   : > { %vm477_vm6 = vcmp.eq.s32.totalorder %v2424_v62, %v451_v43 }
 0x100   : > { %v568_v48 = vsel %vm533_vm3, %v526_v27, 0  ;;  %v1827_v49 = vsel %vm477_vm6, 1.0, %v2253_v3 }
 0x101   : > { %v2636_v50 = vand.u32 4294901760, %v568_v48  ;;  %v525_v21 = vadd.f32 %v1827_v49, %v397_v46 }
 0x103   : > { %v2639_v5 = vsub.f32 %v568_v48, %v2636_v50  ;;  %v565_v52 = vsel %vm533_vm3, %v525_v21, 0  ;;  %v201_v53 = vpop.permute.xlu1 %200 }
 0x104   : > { %v2642_v26 = vand.u32 4294901760, %v565_v52  ;;  %vm223_vm11 = vcmp.eq.s32.totalorder %v2424_v62, %v201_v53 }
 0x105   : > { %v761_v56 = vand.u32 4294901760, %v2639_v5  ;;  %v1797_v41 = vsel %vm223_vm11, 1.0, %v2253_v3 }
 0x106   : > { %v2646_v57 = vsub.f32 %v565_v52, %v2642_v26  ;;  %1994 = vmatprep.mubr.f32.mxu1 %v2642_v26 }
 0x107   : > { %1995 = vmatmul.mubr.f32.gmra.mxu1 %v2636_v50  ;;  %v762_v10 = vsub.f32 %v2639_v5, %v761_v56 }
 0x108   : > { %v329_v63 = vpop.permute.xlu1 %328  ;;  %v751_v7 = vand.u32 4294901760, %v2646_v57 }
 0x109   : > { %vm351_vm8 = vcmp.eq.s32.totalorder %v2424_v62, %v329_v63  ;;  %v763_v8 = vand.u32 4294901760, %v762_v10 }
 0x10a   : > { %v752_v11 = vsub.f32 %v2646_v57, %v751_v7  ;;  %v1813_v32 = vsel %vm351_vm8, 1.0, %v2253_v3 }
 0x10b   : > { %v399_v46 = vadd.f32 %v1813_v32, %v1797_v41 }
 0x10c   : > { %v332_v29 = vpop.permute.xlu1 %331  ;;  %v753_v30 = vand.u32 4294901760, %v752_v11 }
 0x10d   : > { %vm352_vm10 = vcmp.eq.s32.totalorder %v2424_v62, %v332_v29 }
 0x10e   : > { %v1814_v34 = vsel %vm352_vm10, 1.0, %v2253_v3  ;;  %1966 = vmatprep.mubr.f32.mxu0 %v753_v30 }
 0x10f   : > { %v400_v36 = vadd.f32 %v1814_v34, %v1798_v33  ;;  %1967 = vmatmul.mubr.f32.gmra.mxu0 %v763_v8  ;;  %v466_v34 = vpop.permute.xlu0 %465 }
 0x110   : > { %vm482_vm15 = vcmp.eq.s32.totalorder %v2424_v62, %v466_v34 }
 0x111   : > { %v528_v27 = vadd.f32 %v1830_v38, %v400_v36  ;;  %v457_v43 = vpop.permute.xlu1 %456  ;;  %v1832_v40 = vsel %vm482_vm15, 1.0, %v2253_v3 }
 0x112   : > { %vm479_vm12 = vcmp.eq.s32.totalorder %v2424_v62, %v457_v43 }
 0x113   : > { %v574_v48 = vsel %vm533_vm3, %v528_v27, 0  ;;  %v1829_v49 = vsel %vm479_vm12, 1.0, %v2253_v3  ;;  %v1800_v27 = vsel %vm226_vm13, 1.0, %v2253_v3 }
 0x114   : > { %v2671_v21 = vand.u32 4294901760, %v574_v48  ;;  %v527_v52 = vadd.f32 %v1829_v49, %v399_v46 }
 0x116   : > { %v2674_v53 = vsub.f32 %v574_v48, %v2671_v21  ;;  %v571_v63 = vsel %vm533_vm3, %v527_v52, 0  ;;  %v207_v10 = vpop.permute.xlu1 %206 }
 0x117   : > { %v2677_v11 = vand.u32 4294901760, %v571_v63  ;;  %vm225_vm1 = vcmp.eq.s32.totalorder %v2424_v62, %v207_v10 }
 0x118   : > { %v781_v16 = vand.u32 4294901760, %v2674_v53  ;;  %v1799_v49 = vsel %vm225_vm1, 1.0, %v2253_v3 }
 0x119   : > { %v2681_v29 = vsub.f32 %v571_v63, %v2677_v11  ;;  %1997 = vmatprep.mubr.f32.mxu1 %v2677_v11 }
 0x11a   : > { %1998 = vmatmul.mubr.f32.gmra.mxu1 %v2671_v21  ;;  %v782_v33 = vsub.f32 %v2674_v53, %v781_v16 }
 0x11b   : > { %v335_v30 = vpop.permute.xlu1 %334  ;;  %v771_v8 = vand.u32 4294901760, %v2681_v29 }
 0x11c   : > { %vm353_vm14 = vcmp.eq.s32.totalorder %v2424_v62, %v335_v30  ;;  %v783_v41 = vand.u32 4294901760, %v782_v33 }
 0x11d   : > { %v772_v32 = vsub.f32 %v2681_v29, %v771_v8  ;;  %v1815_v46 = vsel %vm353_vm14, 1.0, %v2253_v3 }
 0x11e   : > { %v401_v30 = vadd.f32 %v1815_v46, %v1799_v49 }
 0x11f   : > { %v338_v36 = vpop.permute.xlu1 %337  ;;  %v773_v38 = vand.u32 4294901760, %v772_v32 }
 0x120   : > { %vm354_vm0 = vcmp.eq.s32.totalorder %v2424_v62, %v338_v36 }
 0x121   : > { %v1816_v43 = vsel %vm354_vm0, 1.0, %v2253_v3  ;;  %1969 = vmatprep.mubr.f32.mxu0 %v773_v38 }
 0x122   : > { %v402_v48 = vadd.f32 %v1816_v43, %v1800_v27  ;;  %1970 = vmatmul.mubr.f32.gmra.mxu0 %v783_v41 }
 0x124   : > { %v530_v52 = vadd.f32 %v1832_v40, %v402_v48  ;;  %v463_v63 = vpop.permute.xlu1 %462 }
 0x125   : > { %vm481_vm2 = vcmp.eq.s32.totalorder %v2424_v62, %v463_v63 }
 0x126   : > { %v580_v33 = vsel %vm533_vm3, %v530_v52, 0  ;;  %v1831_v10 = vsel %vm481_vm2, 1.0, %v2253_v3 }
 0x127   : > { %v2706_v34 = vand.u32 4294901760, %v580_v33  ;;  %v529_v32 = vadd.f32 %v1831_v10, %v401_v30 }
 0x129   : > { %v800_v36 = vsub.f32 %v580_v33, %v2706_v34  ;;  %v577_v38 = vsel %vm533_vm3, %v529_v32, 0 }
 0x12a   : > { %v2710_v41 = vand.u32 4294901760, %v577_v38 }
 0x12b   : > { %v801_v27 = vand.u32 4294901760, %v800_v36 }
 0x12c   : > { %v790_v43 = vsub.f32 %v577_v38, %v2710_v41  ;;  %2000 = vmatprep.mubr.f32.mxu1 %v2710_v41 }
 0x12d   : > { %2001 = vmatmul.mubr.f32.gmra.mxu1 %v2706_v34  ;;  %v802_v3 = vsub.f32 %v800_v36, %v801_v27 }
 0x12e   : > { %2035 = vmatprep.mubr.f32.mxu1 %v651_v24  ;;  %v791_v62 = vand.u32 4294901760, %v790_v43 }
 0x12f   : > { %v803_v40 = vand.u32 4294901760, %v802_v3 }
 0x130   : > { %v792_v46 = vsub.f32 %v790_v43, %v791_v62 }
 0x131   : > { %2036 = vmatmul.mubr.f32.vlgmr.msra.gmra.mxu1 %v661_v13 }
 0x132   : > { %2038 = vmatprep.mubr.f32.mxu1 %v671_v1  ;;  %v793_v48 = vand.u32 4294901760, %v792_v46  ;;  %2088 = vmatpush3.msra.mxu1 %v2358_v19 }
 0x133   : > { %2089 = vmatprep.subr.mxu1 %v2367_v22 }
 0x134   : > { %1972 = vmatprep.mubr.f32.mxu0 %v793_v48  ;;  %2090 = vmatpush3.msra.mxu1 %v2367_v22 }
 0x135   : > { %1973 = vmatmul.mubr.f32.gmra.mxu0 %v803_v40  ;;  %2039 = vmatmul.mubr.f32.gmra.mxu1 %v681_v35 }
 0x136   : > { %2007 = vmatprep.mubr.f32.mxu0 %v2443_v20  ;;  %2041 = vmatprep.mubr.f32.mxu1 %v691_v47 }
 0x139   : > { %2008 = vmatmul.mubr.f32.vlgmr.msra.gmra.mxu0 %v2496_v4  ;;  %2042 = vmatmul.mubr.f32.gmra.mxu1 %v701_v45 }
 0x13a   : > { %2060 = vmatpush3.msra.mxu0 %v2376_v25  ;;  %2010 = vmatprep.mubr.f32.mxu0 %v2480_v51 }
 0x13b   : > { %2044 = vmatprep.mubr.f32.mxu1 %v711_v23  ;;  %2061 = vmatprep.subr.mxu0 %v2388_v28 }
 0x13c   : > { %2062 = vmatpush3.msra.mxu0 %v2388_v28 }
 0x13d   : > { %2011 = vmatmul.mubr.f32.gmra.mxu0 %v2515_v18  ;;  %2045 = vmatmul.mubr.f32.gmra.mxu1 %v721_v14 }
 0x13e   : > { %2013 = vmatprep.mubr.f32.mxu0 %v2536_v42  ;;  %2047 = vmatprep.mubr.f32.mxu1 %v731_v2 }
 0x141   : > { %2014 = vmatmul.mubr.f32.gmra.mxu0 %v2530_v39  ;;  %2048 = vmatmul.mubr.f32.gmra.mxu1 %v741_v60 }
 0x142   : > { %2016 = vmatprep.mubr.f32.mxu0 %v2576_v15  ;;  %2050 = vmatprep.mubr.f32.mxu1 %v751_v7 }
 0x145   : > { %2017 = vmatmul.mubr.f32.gmra.mxu0 %v2569_v9  ;;  %2051 = vmatmul.mubr.f32.gmra.mxu1 %v761_v56 }
 0x146   : > { %2019 = vmatprep.mubr.f32.mxu0 %v2611_v61  ;;  %2053 = vmatprep.mubr.f32.mxu1 %v771_v8 }
 0x149   : > { %2020 = vmatmul.mubr.f32.gmra.mxu0 %v2604_v55  ;;  %2054 = vmatmul.mubr.f32.gmra.mxu1 %v781_v16 }
 0x14a   : > { %2022 = vmatprep.mubr.f32.mxu0 %v2646_v57  ;;  %2056 = vmatprep.mubr.f32.mxu1 %v791_v62 }
 0x14d   : > { %2023 = vmatmul.mubr.f32.gmra.mxu0 %v2639_v5  ;;  %2057 = vmatmul.mubr.f32.gmra.mxu1 %v801_v27 }
 0x14e   : > { %2025 = vmatprep.mubr.f32.mxu0 %v2681_v29  ;;  %2091 = vmatprep.mubr.f32.mxu1 %v2437_v17 }
 0x151   : > { %2026 = vmatmul.mubr.f32.gmra.mxu0 %v2674_v53  ;;  %2092 = vmatmul.mubr.f32.vlgmr.msra.gmra.mxu1 %v2489_v59 }
 0x152   : > { %2028 = vmatprep.mubr.f32.mxu0 %v790_v43  ;;  %2094 = vmatprep.mubr.f32.mxu1 %v2472_v44 }
 0x155   : > { %2029 = vmatmul.mubr.f32.gmra.mxu0 %v800_v36  ;;  %2095 = vmatmul.mubr.f32.gmra.mxu1 %v2503_v0 }
 0x156   : > { %2063 = vmatprep.mubr.f32.mxu0 %v2437_v17  ;;  %2097 = vmatprep.mubr.f32.mxu1 %v2527_v37 }
 0x159   : > { %2064 = vmatmul.mubr.f32.vlgmr.msra.gmra.mxu0 %v2489_v59  ;;  %2098 = vmatmul.mubr.f32.gmra.mxu1 %v2523_v31 }
 0x15a   : > { %2066 = vmatprep.mubr.f32.mxu0 %v2472_v44  ;;  %2100 = vmatprep.mubr.f32.mxu1 %v2572_v12 }
 0x15d   : > { %2067 = vmatmul.mubr.f32.gmra.mxu0 %v2503_v0  ;;  %2101 = vmatmul.mubr.f32.gmra.mxu1 %v2566_v6 }
 0x15e   : > { %2069 = vmatprep.mubr.f32.mxu0 %v2527_v37  ;;  %2103 = vmatprep.mubr.f32.mxu1 %v2607_v58 }
 0x161   : > { %2070 = vmatmul.mubr.f32.gmra.mxu0 %v2523_v31  ;;  %2104 = vmatmul.mubr.f32.gmra.mxu1 %v2601_v54 }
 0x162   : > { %2072 = vmatprep.mubr.f32.mxu0 %v2572_v12  ;;  %2106 = vmatprep.mubr.f32.mxu1 %v2642_v26 }
 0x165   : > { %2073 = vmatmul.mubr.f32.gmra.mxu0 %v2566_v6  ;;  %2107 = vmatmul.mubr.f32.gmra.mxu1 %v2636_v50 }
 0x166   : > { %2075 = vmatprep.mubr.f32.mxu0 %v2607_v58  ;;  %2109 = vmatprep.mubr.f32.mxu1 %v2677_v11 }
 0x169   : > { %2076 = vmatmul.mubr.f32.gmra.mxu0 %v2601_v54  ;;  %2110 = vmatmul.mubr.f32.gmra.mxu1 %v2671_v21 }
 0x16a   : > { %2078 = vmatprep.mubr.f32.mxu0 %v2642_v26  ;;  %2112 = vmatprep.mubr.f32.mxu1 %v2710_v41 }
 0x16d   : > { %2079 = vmatmul.mubr.f32.gmra.mxu0 %v2636_v50  ;;  %2113 = vmatmul.mubr.f32.gmra.mxu1 %v2706_v34 }
 0x16e   : > { %2081 = vmatprep.mubr.f32.mxu0 %v2677_v11 }
 0x171   : > { %2082 = vmatmul.mubr.f32.gmra.mxu0 %v2671_v21 }
 0x172   : > { %2084 = vmatprep.mubr.f32.mxu0 %v2710_v41 }
 0x175   : > { %2085 = vmatmul.mubr.f32.gmra.mxu0 %v2706_v34 }
 0x184   : > { %v1981_v19 = vpop.f32.mrf.mxu1 }
 0x186   : > { %v2795_v22 = vpop.f32.mrf.mxu1 }
 0x188   : > { %v2797_v25 = vpop.f32.mrf.mxu1 }
 0x18a   : > { %v2799_v17 = vpop.f32.mrf.mxu1 }
 0x18c   : > { %v1953_v28 = vpop.f32.mrf.mxu0 }
 0x18d   : > { %v893_v48 = vadd.f32 %v1981_v19, %v1953_v28 }
 0x18e   : > { %v655_v20 = vpop.f32.mrf.mxu0  ;;  %v2801_v24 = vpop.f32.mrf.mxu1 }
 0x190   : > { %v2803_v44 = vpop.f32.mrf.mxu0  ;;  %v2805_v51 = vpop.f32.mrf.mxu1 }
 0x192   : > { %v2807_v59 = vpop.f32.mrf.mxu0 }
 0x193   : > { %v899_v19 = vadd.f32 %v2799_v17, %v2807_v59 }
 0x196   : > { %v2811_v4 = vpop.f32.mrf.mxu0 }
 0x198   : > { %v2815_v13 = vpop.f32.mrf.mxu0 }
 0x1a1   : > { %v2809_v1 = vpop.f32.mrf.mxu1 }
 0x1a3   : > { %v2813_v0 = vpop.f32.mrf.mxu1 }
 0x1a9   : > { %v2819_v31 = vpop.f32.mrf.mxu0 }
 0x1ab   : > { %v2823_v37 = vpop.f32.mrf.mxu0 }
 0x1b4   : > { %v2817_v18 = vpop.f32.mrf.mxu1 }
 0x1b6   : > { %v2821_v35 = vpop.f32.mrf.mxu1 }
 0x1bc   : > { %v2827_v42 = vpop.f32.mrf.mxu0 }
 0x1be   : > { %v2831_v47 = vpop.f32.mrf.mxu0 }
 0x1c7   : > { %v2825_v39 = vpop.f32.mrf.mxu1 }
 0x1c9   : > { %v2829_v45 = vpop.f32.mrf.mxu1 }
 0x1cf   : > { %v2835_v9 = vpop.f32.mrf.mxu0 }
 0x1d1   : > { %v2839_v14 = vpop.f32.mrf.mxu0 }
 0x1da   : > { %v2833_v6 = vpop.f32.mrf.mxu1 }
 0x1dc   : > { %v2837_v12 = vpop.f32.mrf.mxu1 }
 0x1e2   : > { %v2843_v23 = vpop.f32.mrf.mxu0 }
 0x1e4   : > { %v2847_v58 = vpop.f32.mrf.mxu0 }
 0x1ed   : > { %v2841_v15 = vpop.f32.mrf.mxu1 }
 0x1ee   : > { %3022 = vst [vmem:[#allocation5_spill] sm:$0xff] %v2841_v15 }
 0x1ef   : > { %v2845_v54 = vpop.f32.mrf.mxu1 }
 0x1f0   : > { %3023 = vst [vmem:[#allocation6_spill] sm:$0xff] %v2845_v54  ;;  %v887_v54 = vadd.f32 %v2795_v22, %v655_v20 }
 0x1f1   : > { %v2037_v55 = vpop.f32.mrf.mxu1 }
 0x1f3   : > { %v1232_v60 = vpop.f32.mrf.mxu1 }
 0x1f5   : > { %v2849_v61 = vpop.f32.mrf.mxu0  ;;  %v2040_v2 = vpop.f32.mrf.mxu1 }
 0x1f6   : > { %3024 = vst [vmem:[#allocation7_spill] sm:$0xff] %v2849_v61 }
 0x1f7   : > { %v2851_v50 = vpop.f32.mrf.mxu0  ;;  %v2853_v5 = vpop.f32.mrf.mxu1 }
 0x1f8   : > { %3025 = vst [vmem:[#allocation8_spill] sm:$0xff] %v2851_v50 }
 0x1f9   : > { %v2009_v26 = vpop.f32.mrf.mxu0  ;;  %v2855_v56 = vpop.f32.mrf.mxu1 }
 0x1fa   : > { %v1060_v50 = vadd.f32 %v2009_v26, %v893_v48  ;;  %v917_v26 = vadd.f32 %v2801_v24, %v2811_v4 }
 0x1fb   : > { %v1052_v57 = vpop.f32.mrf.mxu0  ;;  %v2857_v7 = vpop.f32.mrf.mxu1 }
 0x1fc   : > { %v1053_v15 = vadd.f32 %v1052_v57, %v887_v54 }
 0x1fd   : > { %v2012_v21 = vpop.f32.mrf.mxu0  ;;  %v2859_v53 = vpop.f32.mrf.mxu1 }
 0x1ff   : > { %v1066_v11 = vpop.f32.mrf.mxu0  ;;  %v2861_v16 = vpop.f32.mrf.mxu1 }
 0x200   : > { %v1067_v48 = vadd.f32 %v1066_v11, %v899_v19 }
 0x201   : > { %v2015_v29 = vpop.f32.mrf.mxu0  ;;  %v2863_v8 = vpop.f32.mrf.mxu1 }
 0x202   : > { %v1088_v57 = vadd.f32 %v2015_v29, %v917_v26  ;;  %v1249_v4 = vadd.f32 %v2853_v5, %v1067_v48  ;;  %v941_v29 = vadd.f32 %v2817_v18, %v2827_v42 }
 0x203   : > { %v1080_v49 = vpop.f32.mrf.mxu0  ;;  %v2865_v52 = vpop.f32.mrf.mxu1 }
 0x204   : > { %v1273_v11 = vadd.f32 %v2855_v56, %v1088_v57 }
 0x205   : > { %v2018_v63 = vpop.f32.mrf.mxu0  ;;  %v2867_v30 = vpop.f32.mrf.mxu1 }
 0x206   : > { %3026 = vst [vmem:[#allocation9_spill] sm:$0xff] %v2867_v30  ;;  %v1233_v30 = vadd.f32 %v1232_v60, %v1053_v15 }
 0x207   : > { %v1094_v33 = vpop.f32.mrf.mxu0  ;;  %v2869_v10 = vpop.f32.mrf.mxu1 }
 0x208   : > { %3027 = vst [vmem:[#allocation10_spill] sm:$0xff] %v2869_v10 }
 0x209   : > { %v2871_v34 = vpop.f32.mrf.mxu0  ;;  %v2873_v32 = vpop.f32.mrf.mxu1 }
 0x20a   : > { %3028 = vst [vmem:[#allocation11_spill] sm:$0xff] %v2873_v32 }
 0x20b   : > { %v2875_v36 = vpop.f32.mrf.mxu0  ;;  %v2877_v38 = vpop.f32.mrf.mxu1 }
 0x20c   : > { %3029 = vst [vmem:[#allocation12_spill] sm:$0xff] %v2877_v38 }
 0x20d   : > { %v2879_v41 = vpop.f32.mrf.mxu0  ;;  %v2881_v27 = vpop.f32.mrf.mxu1 }
 0x20e   : > { %3030 = vst [vmem:[#allocation13_spill] sm:$0xff] %v2881_v27  ;;  %v905_v27 = vadd.f32 %v2797_v25, %v2803_v44  ;;  %v911_v25 = vadd.f32 %v2805_v51, %v2815_v13  ;;  %v923_v13 = vadd.f32 %v2813_v0, %v2823_v37  ;;  %v935_v37 = vadd.f32 %v2821_v35, %v2831_v47 }
 0x20f   : > { %v2883_v43 = vpop.f32.mrf.mxu0  ;;  %v2885_v62 = vpop.f32.mrf.mxu1 }
 0x210   : > { %3031 = vst [vmem:[#allocation14_spill] sm:$0xff] %v2885_v62  ;;  %v1074_v28 = vadd.f32 %v2012_v21, %v905_v27  ;;  %v1081_v27 = vadd.f32 %v1080_v49, %v911_v25 }
 0x211   : > { %v2887_v3 = vpop.f32.mrf.mxu0  ;;  %v2093_v46 = vpop.f32.mrf.mxu1 }
 0x212   : > { %v1257_v59 = vadd.f32 %v2040_v2, %v1074_v28  ;;  %v1265_v0 = vadd.f32 %v2857_v7, %v1081_v27  ;;  %v1109_v7 = vadd.f32 %v2875_v36, %v935_v37  ;;  %v965_v36 = vadd.f32 %v2833_v6, %v2843_v23  ;;  %v3035_v23 = vld [vmem:[#allocation9_spill] sm:$0xff]  ;;  %v3041_v27 = vld [vmem:[#allocation6_spill] sm:$0xff] }
 0x213   : > { %v2889_v40 = vpop.f32.mrf.mxu0  ;;  %v1592_v32 = vpop.f32.mrf.mxu1 }
 0x214   : > { %3032 = vst [vmem:[#allocation15_spill] sm:$0xff] %v2889_v40  ;;  %v1241_v40 = vadd.f32 %v2037_v55, %v1060_v50  ;;  %v929_v55 = vadd.f32 %v2809_v1, %v2819_v31  ;;  %v1144_v25 = vadd.f32 %v2887_v3, %v965_v36  ;;  %v3040_v3 = vld [vmem:[#allocation8_spill] sm:$0xff] }
 0x215   : > { %v2892_v38 = vpop.f32.mrf.mxu0  ;;  %v2096_v10 = vpop.f32.mrf.mxu1 }
 0x216   : > { %3033 = vst [vmem:[#allocation16_spill] sm:$0xff] %v2892_v38  ;;  %v1102_v2 = vadd.f32 %v2018_v63, %v929_v55 }
 0x217   : > { %v2897_v62 = vpop.f32.mrf.mxu0  ;;  %v1604_v61 = vpop.f32.mrf.mxu1 }
 0x218   : > { %3034 = vst [vmem:[#allocation17_spill] sm:$0xff] %v2897_v62  ;;  %v1289_v42 = vadd.f32 %v2859_v53, %v1102_v2  ;;  %v3043_v2 = vld [vmem:[#allocation11_spill] sm:$0xff] }
 0x219   : > { %v2065_v22 = vpop.f32.mrf.mxu0  ;;  %v2099_v20 = vpop.f32.mrf.mxu1 }
 0x21a   : > { %v1436_v38 = vadd.f32 %v2065_v22, %v1241_v40 }
 0x21b   : > { %v1429_v44 = vpop.f32.mrf.mxu0  ;;  %v1616_v54 = vpop.f32.mrf.mxu1  ;;  %v3038_v55 = vld [vmem:[#allocation15_spill] sm:$0xff] }
 0x21c   : > { %v1599_v62 = vadd.f32 %v2093_v46, %v1436_v38  ;;  %v1430_v17 = vadd.f32 %v1429_v44, %v1233_v30 }
 0x21d   : > { %v2068_v50 = vpop.f32.mrf.mxu0  ;;  %v2102_v21 = vpop.f32.mrf.mxu1 }
 0x21e   : > { %1687 = vst [vmem:[%s2909_s4 + $0x8] sm:$0xff] %v1599_v62  ;;  %v1593_v24 = vadd.f32 %v1592_v32, %v1430_v17  ;;  %v1448_v51 = vadd.f32 %v2068_v50, %v1257_v59  ;;  %v1095_v32 = vadd.f32 %v1094_v33, %v923_v13  ;;  %v1116_v62 = vadd.f32 %v2871_v34, %v941_v29 }
 0x21f   : > { %v1441_v15 = vpop.f32.mrf.mxu0  ;;  %v1628_v60 = vpop.f32.mrf.mxu1  ;;  %v953_v33 = vadd.f32 %v2825_v39, %v2835_v9  ;;  %v947_v34 = vadd.f32 %v2829_v45, %v2839_v14  ;;  %v1297_v14 = vadd.f32 %v2865_v52, %v1109_v7  ;;  %v3044_v29 = vld [vmem:[#allocation17_spill] sm:$0xff] }
 0x220   : > { %1686 = vst [vmem:[%s2909_s4] sm:$0xff] %v1593_v24  ;;  %v1611_v1 = vadd.f32 %v2096_v10, %v1448_v51  ;;  %v1442_v31 = vadd.f32 %v1441_v15, %v1249_v4  ;;  %v1281_v40 = vadd.f32 %v2861_v16, %v1095_v32  ;;  %v1305_v9 = vadd.f32 %v2863_v8, %v1116_v62  ;;  %v3042_v4 = vld [vmem:[#allocation16_spill] sm:$0xff] }
 0x221   : > { %v2071_v49 = vpop.f32.mrf.mxu0  ;;  %v2105_v30 = vpop.f32.mrf.mxu1  ;;  %v1130_v28 = vadd.f32 %v2879_v41, %v953_v33  ;;  %v1123_v26 = vadd.f32 %v2883_v43, %v947_v34  ;;  %v959_v41 = vadd.f32 %v2837_v12, %v2847_v58  ;;  %v3037_v43 = vld [vmem:[#allocation5_spill] sm:$0xff]  ;;  %v3039_v58 = vld [vmem:[#allocation10_spill] sm:$0xff]  ;;  %v971_v24 = vadd.f32 %v3041_v27, %v3040_v3 }
 0x222   : > { %1689 = vst [vmem:[%s2909_s4 + $0x18] sm:$0xff] %v1611_v1  ;;  %v1605_v5 = vadd.f32 %v1604_v61, %v1442_v31  ;;  %v1460_v38 = vadd.f32 %v2071_v49, %v1273_v11  ;;  %v1337_v1 = vadd.f32 %v3043_v2, %v1144_v25 }
 0x223   : > { %v1453_v63 = vpop.f32.mrf.mxu0  ;;  %v1640_v10 = vpop.f32.mrf.mxu1  ;;  %v1321_v44 = vadd.f32 %v3035_v23, %v1130_v28  ;;  %v1137_v52 = vadd.f32 %v3038_v55, %v959_v41  ;;  %v1151_v49 = vadd.f32 %v3044_v29, %v971_v24 }
 0x224   : > { %1688 = vst [vmem:[%s2909_s4 + $0x10] sm:$0xff] %v1605_v5  ;;  %v1623_v56 = vadd.f32 %v2099_v20, %v1460_v38  ;;  %v1454_v18 = vadd.f32 %v1453_v63, %v1265_v0  ;;  %v3045_v5 = vld [vmem:[#allocation12_spill] sm:$0xff] }
 0x225   : > { %v2074_v61 = vpop.f32.mrf.mxu0  ;;  %v2108_v46 = vpop.f32.mrf.mxu1  ;;  %v1329_v38 = vadd.f32 %v3045_v5, %v1137_v52 }
 0x226   : > { %1691 = vst [vmem:[%s2909_s4 + $0x28] sm:$0xff] %v1623_v56  ;;  %v1617_v35 = vadd.f32 %v1616_v54, %v1454_v18  ;;  %v1472_v47 = vadd.f32 %v2074_v61, %v1289_v42  ;;  %v3036_v54 = vld [vmem:[#allocation7_spill] sm:$0xff]  ;;  %v3047_v61 = vld [vmem:[#allocation14_spill] sm:$0xff] }
 0x227   : > { %v1465_v19 = vpop.f32.mrf.mxu0  ;;  %v1652_v22 = vpop.f32.mrf.mxu1  ;;  %v977_v57 = vadd.f32 %v3037_v43, %v3036_v54 }
 0x228   : > { %1690 = vst [vmem:[%s2909_s4 + $0x20] sm:$0xff] %v1617_v35  ;;  %v1635_v53 = vadd.f32 %v2102_v21, %v1472_v47  ;;  %v1466_v39 = vadd.f32 %v1465_v19, %v1281_v40  ;;  %v1313_v21 = vadd.f32 %v3039_v58, %v1123_v26 }
 0x229   : > { %v2077_v20 = vpop.f32.mrf.mxu0  ;;  %v2111_v17 = vpop.f32.mrf.mxu1  ;;  %v1158_v13 = vadd.f32 %v3042_v4, %v977_v57 }
 0x22a   : > { %1693 = vst [vmem:[%s2909_s4 + $0x38] sm:$0xff] %v1635_v53  ;;  %v1629_v16 = vadd.f32 %v1628_v60, %v1466_v39  ;;  %v1484_v45 = vadd.f32 %v2077_v20, %v1305_v9 }
 0x22b   : > { %v1477_v48 = vpop.f32.mrf.mxu0  ;;  %v1664_v31 = vpop.f32.mrf.mxu1 }
 0x22c   : > { %1692 = vst [vmem:[%s2909_s4 + $0x30] sm:$0xff] %v1629_v16  ;;  %v1647_v8 = vadd.f32 %v2105_v30, %v1484_v45  ;;  %v1478_v6 = vadd.f32 %v1477_v48, %v1297_v14 }
 0x22d   : > { %v2080_v59 = vpop.f32.mrf.mxu0  ;;  %v2114_v56 = vpop.f32.mrf.mxu1 }
 0x22e   : > { %1695 = vst [vmem:[%s2909_s4 + $0x48] sm:$0xff] %v1647_v8  ;;  %v1641_v50 = vadd.f32 %v1640_v10, %v1478_v6  ;;  %v1496_v12 = vadd.f32 %v2080_v59, %v1321_v44  ;;  %v3046_v10 = vld [vmem:[#allocation13_spill] sm:$0xff] }
 0x22f   : > { %v1489_v51 = vpop.f32.mrf.mxu0  ;;  %v1353_v62 = vadd.f32 %v3046_v10, %v1158_v13  ;;  %v1676_v40 = vpop.f32.mrf.mxu1 }
 0x230   : > { %1694 = vst [vmem:[%s2909_s4 + $0x40] sm:$0xff] %v1641_v50  ;;  %v1659_v15 = vadd.f32 %v2108_v46, %v1496_v12  ;;  %v1490_v60 = vadd.f32 %v1489_v51, %v1313_v21  ;;  %v1345_v46 = vadd.f32 %v3047_v61, %v1151_v49 }
 0x231   : > { %v2083_v11 = vpop.f32.mrf.mxu0 }
 0x232   : > { %1697 = vst [vmem:[%s2909_s4 + $0x58] sm:$0xff] %v1659_v15  ;;  %v1653_v30 = vadd.f32 %v1652_v22, %v1490_v60  ;;  %v1508_v32 = vadd.f32 %v2083_v11, %v1337_v1 }
 0x233   : > { %v1501_v0 = vpop.f32.mrf.mxu0 }
 0x234   : > { %1696 = vst [vmem:[%s2909_s4 + $0x50] sm:$0xff] %v1653_v30  ;;  %v1671_v37 = vadd.f32 %v2111_v17, %v1508_v32  ;;  %v1502_v63 = vadd.f32 %v1501_v0, %v1329_v38 }
 0x235   : > { %v2086_v18 = vpop.f32.mrf.mxu0 }
 0x236   : > { %1699 = vst [vmem:[%s2909_s4 + $0x68] sm:$0xff] %v1671_v37  ;;  %v1665_v42 = vadd.f32 %v1664_v31, %v1502_v63  ;;  %v1520_v33 = vadd.f32 %v2086_v18, %v1353_v62 }
 0x237   : > { %v1513_v7 = vpop.f32.mrf.mxu0 }
 0x238   : > { %1698 = vst [vmem:[%s2909_s4 + $0x60] sm:$0xff] %v1665_v42  ;;  %v1683_v35 = vadd.f32 %v2114_v56, %v1520_v33  ;;  %v1514_v47 = vadd.f32 %v1513_v7, %v1345_v46 }
 0x23a   : > { %1701 = vst [vmem:[%s2909_s4 + $0x78] sm:$0xff] %v1683_v35  ;;  %v1677_v34 = vadd.f32 %v1676_v40, %v1514_v47 }
 0x23c   : > { %1700 = vst [vmem:[%s2909_s4 + $0x70] sm:$0xff] %v1677_v34 }
 0x23d   : > { %2201 = shalt.err (!%p2198_p3)
}
 0x23e   : > { %s2202_s23 = scalar_lea.hbm %s2969_s14, 2048  ;;  %s2206_s26 = scalar_lea.hbm %s3019_s2, 4096 }
 0x23f   : > { %p2203_p4 = scmp.ne.s32.totalorder %s2969_s14, %s2202_s23  ;;  %p2207_p9 = scmp.lt.s32.totalorder %s2969_s14, %s3019_s2 }
 0x240   : > { %p2208_p10 = scmp.lt.s32.totalorder %s2206_s26, %s2202_s23 }
 0x241   : > { %p2204_p7 = pnand %p2203_p4, %p2310_p5 }
 0x242   : > { %p2209_p11 = por %p2208_p10, %p2207_p9 }
 0x243   : > { %p2205_p8 = pneg %p2204_p7 }
 0x245   : > { %p2210_p12 = pnand %p2209_p11, %p2205_p8 }
 0x247   : > { %2213 = shalt.err (!%p2210_p12)
}
 0x248   : > { %s2255_s29 = smov 128   ;;  %s2256_s30 = smov 8  }
 0x249   : > { %2115 = dma.vmem_to_hbm [thread:$0]  (%p2310_p5), %s2971_s6, 2048, %s2969_s14, %s2977_s13, %s2255_s29, %s2255_s29, %s2256_s30  }
 0x24a PF: > { %p2121_p13 = scmp.ge.s32.totalorder %s2248_s12, 2  ;;  %s1731_s3 = sand.u32 1, %s2236_s9  }
 0x24b   : > { %s1732_s4 = scalar_lea.sflag [#allocation3], %s1731_s3 }
 0x24c   : > { %p2118_p0 = pnand %p2121_p13, %p2314_p6 }
 0x24e   : > { %p2119_p1 = pneg %p2118_p0 }
 0x250   : > { %2231 = dma.done.wait (%p2119_p1), %s1732_s4, 2048  }
 0x251   : > { %2233 = vsyncadd (%p2119_p1), %s1732_s4, 4294965248  ;;  %p12_p2 = scmp.ge.s32.totalorder %s2297_s15, 4   ;;  %s3048_s9 = smov %s2240_s10 }
 0x252   : > { %s3049_s10 = smov %s2244_s11  ;;  %s3050_s11 = smov %s2308_s18 }
 0x253   : > { %s3051_s12 = smov %s2297_s15  ;;  %14 = sbr.rel (!%p12_p2) target bundleno = 3 (0x3), region = 63 }
 0x258   :  { %1737 = vsyncpa [#allocation3], 1 }
 0x259   :  { %1739 = vsyncpa [#allocation3 + $0x1], 1 }

</bundles_post_ra>
